<compile_context>
chip_gen: v6e
topology: v6e:2x2x1
jax: 0.10.0
libtpu: 0.0.40
codegen_flags: <defaults>
</compile_context>

<pallas_src>
import jax
import jax.numpy as jnp
from jax.experimental import pallas as pl
from jax.experimental.pallas import tpu as pltpu


_TM_CAP = 512                      # rows; larger slabs only starve the pipeline
_FALLBACK_VMEM_LIMIT = 32 * 1024 * 1024


def _vmem_limit_bytes():
    """Generation-aware scoped-VMEM limit (v5e/v6e ~80 MiB, v7x ~40 MiB)."""
    try:
        phys = pltpu.get_tpu_info().vmem_capacity_bytes
    except Exception:
        return _FALLBACK_VMEM_LIMIT
    # 5/8 of physical VMEM, capped at 100 MiB:
    #   128 MiB (v5e/v6e) -> 80 MiB scoped;  64 MiB (v7x) -> 40 MiB scoped.
    return int(min(phys * 5 // 8, 100 * 1024 * 1024))


# ----------------------------------------------------------------------------
# Kernels
# ----------------------------------------------------------------------------
def _mul_kernel(est_ref, adj_ref, out_ref):
    # General path: elementwise product on the VPU for the current row slab.
    out_ref[...] = est_ref[...] * adj_ref[...]


def _square_kernel(adj_ref, out_ref):
    # hom=True before any training step: estimated_adj == adj, so compute
    # adj * adj with a single HBM input stream.
    v = adj_ref[...]
    out_ref[...] = v * v


def _make_eye_mul_kernel(two_d):
    # hom=False before any training step: estimated_adj == eye(N).  Build the
    # diagonal mask in-VMEM (iota + select is free VPU work under the DMA roof)
    # instead of streaming a dense N x N identity from HBM.
    def kernel(adj_ref, out_ref):
        tm, tn = out_ref.shape
        row0 = pl.program_id(0) * tm
        col0 = pl.program_id(1) * tn if two_d else 0
        rows = jax.lax.broadcasted_iota(jnp.int32, (tm, tn), 0) + row0
        cols = jax.lax.broadcasted_iota(jnp.int32, (tm, tn), 1) + col0
        v = adj_ref[...]
        out_ref[...] = jnp.where(rows == cols, v, jnp.zeros_like(v))
    return kernel


# ----------------------------------------------------------------------------
# Tiling
# ----------------------------------------------------------------------------
def _choose_tiles(n_rows, n_cols, itemsize, n_streams, budget_bytes):
    """Pick (tm, tn): full-width row slabs sized for a double-buffered pipeline."""
    # Native sublane packing: 8 rows for f32, 16 for bf16, 32 for int8/fp8.
    sub = max(8, 32 // max(itemsize, 1))

    # VMEM bytes needed per slab row across all double-buffered streams.
    bytes_per_row = n_streams * 2 * n_cols * itemsize
    max_tm_budget = budget_bytes // max(bytes_per_row, 1)

    if max_tm_budget < sub:
        # Rows so wide that even a minimal full-width slab overflows the budget:
        # fall back to 2-D tiling with a large, 128-aligned column tile.
        max_tn = budget_bytes // (n_streams * 2 * sub * itemsize)
        tn = max(128, (max_tn // 128) * 128)
        return min(sub, n_rows), min(tn, n_cols)

    # Force >=2 (ideally 4) row slabs so the "parallel" row axis can be sharded
    # across v7x's two TensorCores and read/write DMAs of adjacent steps overlap.
    if n_rows >= 4 * sub:
        target_slabs = 4
    elif n_rows >= 2 * sub:
        target_slabs = 2
    else:
        target_slabs = 1
    tm_from_split = max(sub, ((n_rows // target_slabs) // sub) * sub)

    tm = min((max_tm_budget // sub) * sub, _TM_CAP, tm_from_split)
    tm = max(tm, sub)
    tm = min(tm, n_rows)          # tiny-N case: single full-extent block
    return tm, n_cols


# ----------------------------------------------------------------------------
# Forward
# ----------------------------------------------------------------------------
def estimate_adj_forward(estimated_adj, adj, mode="general"):
    """Pallas implementation of EstimateAdj.forward(): estimated_adj * adj.

    mode:
      "general" -> out = estimated_adj * adj        (3 HBM streams)
      "square"  -> out = adj * adj                  (2 HBM streams, hom=True init)
      "eye"     -> out = eye(N) * adj (diag mask)   (2 HBM streams, hom=False init)
    """
    assert mode in ("general", "square", "eye")
    n_rows, n_cols = adj.shape
    dtype = adj.dtype
    itemsize = jnp.dtype(dtype).itemsize
    n_streams = 2 if mode in ("square", "eye") else 3

    vmem_limit = _vmem_limit_bytes()
    budget = (vmem_limit * 3) // 4          # ~25% headroom for compiler scratch
    tm, tn = _choose_tiles(n_rows, n_cols, itemsize, n_streams, budget)
    grid_rows = pl.cdiv(n_rows, tm)
    grid_cols = pl.cdiv(n_cols, tn)
    two_d = grid_cols > 1

    if two_d:
        grid = (grid_rows, grid_cols)
        index_map = lambda i, j: (i, j)
        semantics = ("parallel", "parallel")
    else:
        grid = (grid_rows,)
        index_map = lambda i: (i, 0)
        semantics = ("parallel",)

    block = pl.BlockSpec((tm, tn), index_map)

    if mode == "square":
        kernel, in_specs, operands = _square_kernel, [block], (adj,)
    elif mode == "eye":
        kernel, in_specs, operands = _make_eye_mul_kernel(two_d), [block], (adj,)
    else:
        assert estimated_adj.shape == adj.shape
        assert estimated_adj.dtype == adj.dtype
        kernel, in_specs, operands = _mul_kernel, [block, block], (estimated_adj, adj)

    cost = pl.CostEstimate(
        flops=n_rows * n_cols,
        transcendentals=0,
        bytes_accessed=n_streams * n_rows * n_cols * itemsize,
    )

    # TODO(synk): biggest remaining lever is fusing this 1-flop/elem multiply
    # with its downstream consumer (symmetrization / normalization in the GCN)
    # instead of isolating it behind a custom-call boundary.
    return pl.pallas_call(
        kernel,
        out_shape=jax.ShapeDtypeStruct((n_rows, n_cols), dtype),
        grid_spec=pltpu.PrefetchScalarGridSpec(
            num_scalar_prefetch=0,
            grid=grid,
            in_specs=in_specs,
            out_specs=block,
        ),
        compiler_params=pltpu.CompilerParams(
            dimension_semantics=semantics,
            vmem_limit_bytes=vmem_limit,
        ),
        cost_estimate=cost,
    )(*operands)


# ----------------------------------------------------------------------------
# Module mirror
# ----------------------------------------------------------------------------
class EstimateAdjJax:
    """JAX/Pallas mirror of the PyTorch EstimateAdj module (forward only)."""

    def __init__(self, adj, num_of_nodes, hom=True, symmetric=False):
        self.num_of_nodes = num_of_nodes
        self.adj = jnp.asarray(adj, dtype=jnp.float32)
        self.hom = hom
        # `symmetric` is stored but never used in the reference forward().
        self.symmetric = symmetric
        # _init_estimation: copy adj if hom else identity.  An explicit mode flag
        # (not a fragile `is` identity check) selects the deduplicated kernel.
        if hom:
            self.estimated_adj = self.adj
            self._mode = "square"
        else:
            self.estimated_adj = jnp.eye(num_of_nodes, dtype=jnp.float32)
            self._mode = "eye"
        # TODO(synk): sample_gumbel / gumbel_softmax_sample are not part of
        # forward(); they are plain jax.random + softmax and are left out of
        # the Pallas kernel.

    def set_estimated_adj(self, value):
        """Call after any parameter update; switches to the general 2-input kernel."""
        self.estimated_adj = jnp.asarray(value, dtype=jnp.float32)
        self._mode = "general"

    def forward(self):
        return estimate_adj_forward(self.estimated_adj, self.adj, mode=self._mode)


if __name__ == "__main__":
    num_of_nodes = 256  # small synthetic graph

    key = jax.random.PRNGKey(0)
    k0, k1, k2 = jax.random.split(key, 3)
    # Deterministic synthetic (dense, weighted) adjacency matrix.
    adj = jax.random.uniform(k0, (num_of_nodes, num_of_nodes), dtype=jnp.float32)

    # hom=True path: estimated_adj == adj at init -> single-input squared kernel.
    model_hom = EstimateAdjJax(adj, num_of_nodes, hom=True)
    out_hom = jax.block_until_ready(model_hom.forward())
    ref_hom = model_hom.estimated_adj * model_hom.adj
    assert out_hom.shape == (num_of_nodes, num_of_nodes)
    assert out_hom.dtype == jnp.float32
    assert jnp.allclose(out_hom, ref_hom, atol=1e-6, rtol=1e-6)

    # hom=False path: eye(N) * adj built in-VMEM (no dense identity HBM stream).
    model_het = EstimateAdjJax(adj, num_of_nodes, hom=False)
    out_het = jax.block_until_ready(model_het.forward())
    ref_het = model_het.estimated_adj * model_het.adj
    assert jnp.allclose(out_het, ref_het, atol=1e-6, rtol=1e-6)

    # General path: after a (simulated) parameter update, two distinct inputs.
    est_upd = jax.random.uniform(k1, (num_of_nodes, num_of_nodes), dtype=jnp.float32)
    model_hom.set_estimated_adj(est_upd)
    out_gen = jax.block_until_ready(model_hom.forward())
    assert jnp.allclose(out_gen, est_upd * adj, atol=1e-6, rtol=1e-6)

    # Partial-last-block sanity check: N not a multiple of the 8-row sublane tile.
    n_odd = 250
    adj_odd = jax.random.uniform(k2, (n_odd, n_odd), dtype=jnp.float32)
    est_odd = adj_odd + 1.0
    out_odd = jax.block_until_ready(
        estimate_adj_forward(est_odd, adj_odd, mode="general"))
    assert jnp.allclose(out_odd, est_odd * adj_odd, atol=1e-6, rtol=1e-6)
    out_odd_eye = jax.block_until_ready(
        estimate_adj_forward(None, adj_odd, mode="eye"))
    assert jnp.allclose(out_odd_eye, jnp.eye(n_odd, dtype=jnp.float32) * adj_odd,
                        atol=1e-6, rtol=1e-6)

    print("KERNEL_OK")
</pallas_src>

<mosaic_0001>
module attributes {stable_mosaic.version = 11 : i64} {
  func.func @_square_kernel(%arg0: i32, %arg1: memref<64x256xf32, #tpu.memory_space<vmem>>, %arg2: memref<64x256xf32, #tpu.memory_space<vmem>>) attributes {dimension_semantics = [#tpu.dimension_semantics<parallel>], iteration_bounds = array<i64: 4>, scalar_prefetch = 0 : i64, scratch_operands = 0 : i64, tpu.core_type = #tpu.core_type<tc>, window_params = [{transform_indices = @transform_0, window_bounds = array<i64: 64, 256>}, {transform_indices = @transform_1, window_bounds = array<i64: 64, 256>}]} {
    %c0 = arith.constant 0 : index
    %c0_0 = arith.constant 0 : index
    %0 = vector.load %arg1[%c0, %c0_0] : memref<64x256xf32, #tpu.memory_space<vmem>>, vector<64x256xf32>
    %1 = arith.mulf %0, %0 : vector<64x256xf32>
    %c0_1 = arith.constant 0 : index
    %c0_2 = arith.constant 0 : index
    %2 = vector.load %arg2[%c0_1, %c0_2] : memref<64x256xf32, #tpu.memory_space<vmem>>, vector<64x256xf32>
    tpu.vector_store %arg2[%c0_1, %c0_2], %1 {strides = array<i32>} : memref<64x256xf32, #tpu.memory_space<vmem>>, vector<64x256xf32>,
    return
  }
  func.func @transform_0(%arg0: i32) -> (i32, i32) {
    %c0_i32 = arith.constant 0 : i32
    %c0_i32_0 = arith.constant 0 : i32
    return %arg0, %c0_i32 : i32, i32
  }
  func.func @transform_1(%arg0: i32) -> (i32, i32) {
    %c0_i32 = arith.constant 0 : i32
    %c0_i32_0 = arith.constant 0 : i32
    return %arg0, %c0_i32 : i32, i32
  }
}

</mosaic_0001>

<bundles_post_ra>
// kernel: tpu_custom_call.1
= control target key start
LH: loop header
LB: loop body
LE: loop exit
PB: predicated region body
PF: predicated region fallthrough
CT: control target
= control target key end

     0   :  { %6 = vsyncpa [#allocation3], 0  ;;  %s643_s0 = inlined_call_operand.hbm [shape: f32[256,256], index: 0, kind: input, shape index: {}]   ;;  %s644_s1 = inlined_call_operand.hbm [shape: f32[256,256], index: 1, kind: output, shape index: {}]  }
   0x1   :  { %8 = vsyncpa [#allocation3 + $0x1], 0 }
   0x2   :  { %9 = vsyncpa [#allocation4], 0 }
   0x3   :  { %11 = vsyncpa [#allocation4 + $0x1], 0  ;;  %s454_s6 = smov 0   ;;  %s456_s7 = smov 0  }
   0x4   :  { %s458_s8 = smov 0   ;;  %s460_s9 = smov 0  }
   0x5 LB: > { %s475_s10 = sadd.s32 4294967295, %s436_s9   ;;  %s274_s11 = sadd.s32 4294967294, %s436_s9   ;;  %s436_s9 = sphi %s460_s9, %s658_s9   ;;  %s432_s8 = sphi %s458_s8, %s657_s8   ;;  %s428_s7 = sphi %s456_s7, %s656_s7   ;;  %s424_s6 = sphi %s454_s6, %s655_s6  }
   0x6   : > { %s479_s12 = sadd.s32 1, %s436_s9   ;;  %s24_s13 = sadd.s32 1, %s432_s8 }
   0x7   : > { %s21_s14 = ssub.s32 %s436_s9, %s479_s12  ;;  %p31_p0 = scmp.ne.s32.totalorder %s432_s8, %s428_s7 }
   0x8   : > { %p22_p1 = scmp.eq.s32.totalorder %s21_s14, 0  ;;  %p32_p2 = scmp.eq.s32.totalorder %s436_s9, 0 }
   0x9   : > { %p37_p3 = scmp.ne.s32.totalorder %s428_s7, %s424_s6  ;;  %p38_p4 = scmp.eq.s32.totalorder %s475_s10, 0 }
   0xa   : > { %s491_s15 = scalar_select %p22_p1, %s432_s8, %s24_s13  }
   0xb   : > { %p493_p5 = por %p32_p2, %p31_p0  ;;  %p497_p6 = por %p38_p4, %p37_p3 }
   0xc   : > { %p61_p7 = scmp.eq.s32.totalorder %s475_s10, 3  ;;  %p67_p8 = scmp.eq.s32.totalorder %s274_s11, 3 }
   0xd   : > { %s648_s17 = scalar_select %p497_p6, 1, 0 }
   0xe   : > { %p306_p9 = scmp.lt.s32.totalorder %s436_s9, 4  ;;  %p503_p10 = por %p61_p7, %p31_p0 }
   0xf   : > { %p507_p11 = por %p67_p8, %p37_p3  ;;  %s87_s20 = sand.u32 1, %s432_s8  }
  0x10   : > { %s649_s18 = scalar_select %p503_p10, 1, 0 }
  0x11   : > { %s650_s19 = scalar_select %p507_p11, 1, 0 }
  0x12   : > { %s291_s21 = sshll.u32 %s436_s9, 11  ;;  %s277_s22 = sshll.u32 %s87_s20, 7 }
  0x13   : > { %s516_s25 = scalar_lea.hbm %s643_s0, %s291_s21  ;;  %s91_s26 = scalar_lea.vmem [#allocation2], %s277_s22 }
  0x14   : > { %s99_s27 = sshll.u32 %s91_s26, 4  ;;  %p520_p12 = pnand %p306_p9, %p493_p5  ;;  %s524_s27 = int_to_ptr.vmem [resolvable:$true] %s99_s27 }
  0x15   : > { %s526_s29 = scalar_lea.sflag [#allocation3], %s87_s20  ;;  %s344_s30 = scalar_lea.hbm %s516_s25, 2048 }
  0x16   : > { %p345_p13 = scmp.ne.s32.totalorder %s516_s25, %s344_s30  ;;  %p346_p0 = pneg %p520_p12 }
  0x17   : > { %s349_s4 = scalar_lea.hbm %s643_s0, 8192  ;;  %p350_p3 = scmp.lt.s32.totalorder %s516_s25, %s643_s0 }
  0x18   : > { %p347_p1 = pnand %p346_p0, %p345_p13  ;;  %p351_p4 = scmp.lt.s32.totalorder %s349_s4, %s344_s30 }
  0x1a   : > { %p348_p2 = pneg %p347_p1  ;;  %p352_p5 = por %p351_p4, %p350_p3 }
  0x1c   : > { %p353_p7 = pnand %p352_p5, %p348_p2 }
  0x1e   : > { %356 = shalt.err (!%p353_p7)
}
  0x1f   : > { %s357_s13 = scalar_lea.vmem %s524_s27, 2048  ;;  %s438_s14 = smov [#allocation2]  }
  0x20   : > { %p358_p8 = scmp.ne.s32.totalorder %s524_s27, %s357_s13  ;;  %s362_s16 = sshll.u32 %s438_s14, 4  ;;  %s363_s16 = int_to_ptr.vmem [resolvable:$false] %s362_s16 }
  0x21   : > { %s364_s20 = scalar_lea.vmem %s363_s16, 4096  ;;  %p365_p1 = scmp.lt.s32.totalorder %s524_s27, %s363_s16 }
  0x22   : > { %p360_p9 = pnand %p358_p8, %p346_p0  ;;  %p366_p11 = scmp.lt.s32.totalorder %s364_s20, %s357_s13 }
  0x24   : > { %p361_p13 = pneg %p360_p9  ;;  %p367_p10 = por %p366_p11, %p365_p1 }
  0x26   : > { %p368_p6 = pnand %p367_p10, %p361_p13 }
  0x28   : > { %371 = shalt.err (!%p368_p6)
}
  0x29   : > { %s439_s21 = smov 256   ;;  %s440_s22 = smov 16  }
  0x2a   : > { %301 = dma.hbm_to_vmem [thread:$0]  (!%p520_p12), %s516_s25, 2048, %s524_s27, %s526_s29, %s439_s21, %s439_s21, %s440_s22  }
  0x2b   : > { %p281_p0 = scmp.ge.s32.totalorder %s436_s9, 1  ;;  %p107_p2 = scmp.lt.s32.totalorder %s436_s9, 5 }
  0x2d   : > { %p108_p3 = pnand %p281_p0, %p107_p2 }
  0x2e   : > { %s550_s23 = sand.u32 (!%p108_p3), 1, %s428_s7   ;;  %p652_p6 = scmp.ne.s32.totalorder (!%p108_p3), %s648_s17, 0 }
  0x2f   : > { %111 = sbr.rel (%p108_p3) target bundleno = 79 (0x4f), region = 24  ;;  %s282_s24 = sshll.u32 (!%p108_p3), %s550_s23, 7 }
  0x30   : > { %s114_s26 = scalar_lea.sflag (!%p108_p3), [#allocation3], %s550_s23  ;;  %s554_s30 = scalar_lea.vmem (!%p108_p3), [#allocation2], %s282_s24 }
  0x34   : > { %415 = dma.done.wait (%p652_p6), %s114_s26, 2048  }
  0x35   : > { %417 = vsyncadd (%p652_p6), %s114_s26, 4294965248  ;;  %v138_v0 = vld [vmem:[%s554_s30] sm:$0xff]  ;;  %v139_v1 = vld [vmem:[%s554_s30 + $0x8] sm:$0xff]  ;;  %s293_s17 = sshll.u32 %s475_s10, 11  ;;  %s570_s25 = scalar_lea.vmem [#allocation5], %s282_s24 }
  0x36   : > { %v140_v2 = vld [vmem:[%s554_s30 + $0x10] sm:$0xff]  ;;  %v154_v3 = vmul.f32 %v138_v0, %v138_v0  ;;  %v155_v4 = vmul.f32 %v139_v1, %v139_v1  ;;  %v141_v6 = vld [vmem:[%s554_s30 + $0x18] sm:$0xff]  ;;  %v142_v7 = vld [vmem:[%s554_s30 + $0x20] sm:$0xff]  ;;  %s201_s27 = sshll.u32 %s570_s25, 4  ;;  %s592_s29 = scalar_lea.hbm %s644_s1, %s293_s17  ;;  %s594_s27 = int_to_ptr.vmem [resolvable:$true] %s201_s27 }
  0x37   : > { %v156_v5 = vmul.f32 %v140_v2, %v140_v2  ;;  %v143_v8 = vld [vmem:[%s554_s30 + $0x28] sm:$0xff]  ;;  %v157_v9 = vmul.f32 %v141_v6, %v141_v6  ;;  %v158_v10 = vmul.f32 %v142_v7, %v142_v7  ;;  %v144_v12 = vld [vmem:[%s554_s30 + $0x30] sm:$0xff]  ;;  %v145_v13 = vld [vmem:[%s554_s30 + $0x38] sm:$0xff]  ;;  %s187_s2 = scalar_lea.sflag [#allocation4], %s550_s23  ;;  %s372_s3 = scalar_lea.vmem %s594_s27, 2048 }
  0x38   : > { %v159_v11 = vmul.f32 %v143_v8, %v143_v8  ;;  %v146_v14 = vld [vmem:[%s554_s30 + $0x40] sm:$0xff]  ;;  %170 = vst [vmem:[%s570_s25] sm:$0xff] %v154_v3  ;;  %171 = vst [vmem:[%s570_s25 + $0x8] sm:$0xff] %v155_v4  ;;  %v160_v15 = vmul.f32 %v144_v12, %v144_v12  ;;  %v161_v16 = vmul.f32 %v145_v13, %v145_v13  ;;  %v147_v18 = vld [vmem:[%s554_s30 + $0x48] sm:$0xff]  ;;  %p373_p10 = scmp.ne.s32.totalorder %s594_s27, %s372_s3  ;;  %p653_p11 = scmp.ne.s32.totalorder %s649_s18, 0 }
  0x39   : > { %172 = vst [vmem:[%s570_s25 + $0x10] sm:$0xff] %v156_v5  ;;  %v162_v17 = vmul.f32 %v146_v14, %v146_v14  ;;  %v148_v19 = vld [vmem:[%s554_s30 + $0x50] sm:$0xff]  ;;  %v149_v20 = vld [vmem:[%s554_s30 + $0x58] sm:$0xff]  ;;  %173 = vst [vmem:[%s570_s25 + $0x18] sm:$0xff] %v157_v9  ;;  %v163_v21 = vmul.f32 %v147_v18, %v147_v18  ;;  %s441_s4 = smov [#allocation5]  }
  0x3a   : > { %174 = vst [vmem:[%s570_s25 + $0x20] sm:$0xff] %v158_v10  ;;  %175 = vst [vmem:[%s570_s25 + $0x28] sm:$0xff] %v159_v11  ;;  %v164_v22 = vmul.f32 %v148_v19, %v148_v19  ;;  %v165_v23 = vmul.f32 %v149_v20, %v149_v20  ;;  %v150_v24 = vld [vmem:[%s554_s30 + $0x60] sm:$0xff]  ;;  %v151_v25 = vld [vmem:[%s554_s30 + $0x68] sm:$0xff]  ;;  %p374_p12 = pnand %p373_p10, %p653_p11  ;;  %s376_s5 = sshll.u32 %s441_s4, 4  ;;  %s377_s5 = int_to_ptr.vmem [resolvable:$false] %s376_s5 }
  0x3b   : > { %v152_v26 = vld [vmem:[%s554_s30 + $0x70] sm:$0xff]  ;;  %176 = vst [vmem:[%s570_s25 + $0x30] sm:$0xff] %v160_v15  ;;  %177 = vst [vmem:[%s570_s25 + $0x38] sm:$0xff] %v161_v16  ;;  %v166_v27 = vmul.f32 %v150_v24, %v150_v24  ;;  %v167_v28 = vmul.f32 %v151_v25, %v151_v25  ;;  %v153_v30 = vld [vmem:[%s554_s30 + $0x78] sm:$0xff]  ;;  %s378_s11 = scalar_lea.vmem %s377_s5, 4096  ;;  %p379_p5 = scmp.lt.s32.totalorder %s594_s27, %s377_s5 }
  0x3c   : > { %178 = vst [vmem:[%s570_s25 + $0x40] sm:$0xff] %v162_v17  ;;  %v168_v29 = vmul.f32 %v152_v26, %v152_v26  ;;  %179 = vst [vmem:[%s570_s25 + $0x48] sm:$0xff] %v163_v21  ;;  %v169_v31 = vmul.f32 %v153_v30, %v153_v30  ;;  %p375_p4 = pneg %p374_p12  ;;  %p380_p7 = scmp.lt.s32.totalorder %s378_s11, %s372_s3 }
  0x3d   : > { %180 = vst [vmem:[%s570_s25 + $0x50] sm:$0xff] %v164_v22  ;;  %181 = vst [vmem:[%s570_s25 + $0x58] sm:$0xff] %v165_v23 }
  0x3e   : > { %182 = vst [vmem:[%s570_s25 + $0x60] sm:$0xff] %v166_v27  ;;  %183 = vst [vmem:[%s570_s25 + $0x68] sm:$0xff] %v167_v28  ;;  %p381_p8 = por %p380_p7, %p379_p5 }
  0x3f   : > { %184 = vst [vmem:[%s570_s25 + $0x70] sm:$0xff] %v168_v29  ;;  %185 = vst [vmem:[%s570_s25 + $0x78] sm:$0xff] %v169_v31 }
  0x40   : > { %p382_p9 = pnand %p381_p8, %p375_p4 }
  0x42   : > { %385 = shalt.err (!%p382_p9)
}
  0x43   : > { %s386_s13 = scalar_lea.hbm %s592_s29, 2048  ;;  %s390_s20 = scalar_lea.hbm %s644_s1, 8192 }
  0x44   : > { %p387_p13 = scmp.ne.s32.totalorder %s592_s29, %s386_s13  ;;  %p391_p2 = scmp.lt.s32.totalorder %s592_s29, %s644_s1 }
  0x45   : > { %p392_p3 = scmp.lt.s32.totalorder %s390_s20, %s386_s13 }
  0x46   : > { %p388_p1 = pnand %p387_p13, %p653_p11 }
  0x47   : > { %p393_p6 = por %p392_p3, %p391_p2 }
  0x48   : > { %p389_p0 = pneg %p388_p1 }
  0x4a   : > { %p394_p10 = pnand %p393_p6, %p389_p0 }
  0x4c   : > { %397 = shalt.err (!%p394_p10)
}
  0x4d   : > { %s442_s24 = smov 256   ;;  %s443_s26 = smov 16  }
  0x4e   : > { %296 = dma.vmem_to_hbm [thread:$0]  (%p653_p11), %s594_s27, 2048, %s592_s29, %s187_s2, %s442_s24, %s442_s24, %s443_s26  }
  0x4f PF: > { %p307_p12 = scmp.ge.s32.totalorder %s436_s9, 2  ;;  %s216_s30 = sand.u32 1, %s424_s6  }
  0x50   : > { %p654_p4 = scmp.ne.s32.totalorder %s650_s19, 0  ;;  %s217_s17 = scalar_lea.sflag [#allocation4], %s216_s30 }
  0x52   : > { %p303_p5 = pnand %p307_p12, %p654_p4 }
  0x54   : > { %p304_p7 = pneg %p303_p5 }
  0x56   : > { %419 = dma.done.wait (%p304_p7), %s217_s17, 2048  }
  0x57   : > { %421 = vsyncadd (%p304_p7), %s217_s17, 4294965248  ;;  %p14_p8 = scmp.ge.s32.totalorder %s479_s12, 6   ;;  %s655_s6 = smov %s428_s7 }
  0x58   : > { %s656_s7 = smov %s432_s8  ;;  %s657_s8 = smov %s491_s15 }
  0x59   : > { %s658_s9 = smov %s479_s12  ;;  %16 = sbr.rel (!%p14_p8) target bundleno = 5 (0x5), region = 69 }
  0x5e   :  { %222 = vsyncpa [#allocation3], 1 }
  0x5f   :  { %224 = vsyncpa [#allocation3 + $0x1], 1 }
  0x60   :  { %225 = vsyncpa [#allocation4], 1 }
  0x61   :  { %227 = vsyncpa [#allocation4 + $0x1], 1 }

</bundles_post_ra>
